<compile_context>
chip_gen: v6e
topology: v6e:2x2x1
jax: 0.10.0
libtpu: 0.0.40
codegen_flags: <defaults>
</compile_context>

<pallas_src>
import functools

import jax
import jax.numpy as jnp
from jax.experimental import pallas as pl
from jax.experimental.pallas import tpu as pltpu


def _round_up(x, m):
    return ((x + m - 1) // m) * m


def _mlp_fused_kernel(*refs, num_layers, output_tanh, matmul_dtype):
    """refs = (x_ref, w0_ref, b0_ref, ..., w{L-1}_ref, b{L-1}_ref, o_ref).

    Whole layer chain in one kernel: intermediates stay in VMEM/vregs.
    """
    x_ref = refs[0]
    o_ref = refs[-1]
    h = x_ref[...].astype(matmul_dtype)              # MXU input dtype (bf16)
    for l in range(num_layers):
        w_ref = refs[1 + 2 * l]
        b_ref = refs[2 + 2 * l]
        acc = jnp.dot(h, w_ref[...], preferred_element_type=jnp.float32)
        acc = acc + b_ref[...]                        # f32 bias add (VPU)
        if l < num_layers - 1:
            acc = jnp.tanh(acc)                       # f32 tanh -> EUP slot
            h = acc.astype(matmul_dtype)              # back to bf16 for next MXU pass
        else:
            if output_tanh:
                acc = jnp.tanh(acc)                   # fused output activation
            h = acc
    o_ref[...] = h.astype(o_ref.dtype)


def mlp_forward(params, x, *, output_activation=None, output_squeeze=False,
                block_m=2048, matmul_dtype=jnp.bfloat16, out_dtype=None):
    """Fused MLP forward. params: list of (w_t [in, out], b [1, out])."""
    M, K = x.shape
    n_layers = len(params)
    n_out = params[-1][0].shape[1]
    out_dtype = x.dtype if out_dtype is None else out_dtype

    # tanh output activations are fused in-kernel; anything else runs in JAX.
    fuse_tanh = output_activation is not None and (
        output_activation is jnp.tanh
        or output_activation is getattr(jax.nn, "tanh", None)
        or output_activation == "tanh")

    # --- lane-dense everywhere: pad every layer's out-dim (and the next
    # layer's in-dim rows) to a multiple of 128; cast weights to bf16.
    layers = []
    prev_pad = K                      # first layer keeps the true obs dim
    for (w, b) in params:
        in_d, out_d = w.shape
        out_pad = _round_up(max(out_d, 128), 128)
        w_p = jnp.pad(w, ((0, prev_pad - in_d), (0, out_pad - out_d)))
        b_p = jnp.pad(b, ((0, 0), (0, out_pad - out_d)))
        layers.append((w_p.astype(matmul_dtype), b_p.astype(jnp.float32)))
        prev_pad = out_pad
    n_pad = prev_pad

    # --- batch tile: as big as the VMEM budget allows (weights resident +
    # double-buffered x/out tiles + f32 activation temporaries).
    tm = min(block_m, _round_up(M, 8))

    def vmem_est(t):
        w_bytes = sum(w.size * w.dtype.itemsize + b.size * b.dtype.itemsize
                      for (w, b) in layers)
        max_w = max(w.shape[1] for (w, _) in layers)
        io = 2 * (t * K * x.dtype.itemsize
                  + t * n_pad * jnp.dtype(out_dtype).itemsize)
        temps = 3 * t * max_w * 4
        return 2 * w_bytes + io + temps    # weights counted double-buffered (conservative)

    while tm > 8 and vmem_est(tm) > 40 * 2**20:   # headroom under v7x's 64 MiB
        tm = _round_up(tm // 2, 8)

    # v7x has 2 TensorCores: make sure the "parallel" batch axis has >=2 tiles.
    if pl.cdiv(M, tm) < 2 and M >= 16:
        tm = _round_up(pl.cdiv(M, 2), 8)

    # Ragged last tile: Pallas clips the DMAs; the out-of-range rows compute
    # garbage that is never stored (the math is row-independent).
    grid = (pl.cdiv(M, tm),)

    vmem = pltpu.MemorySpace.VMEM
    in_specs = [pl.BlockSpec((tm, K), lambda i: (i, 0), memory_space=vmem)]
    flat_inputs = [x]
    for (w, b) in layers:
        # Whole weight/bias as one block with a constant index_map -> fetched
        # once, VMEM-resident across the batch grid.
        # TODO(synk): pipeline_mode=pl.Buffered(1) would single-buffer these
        # resident blocks; omitted for cross-version compile safety.
        in_specs.append(pl.BlockSpec(w.shape, lambda i: (0, 0), memory_space=vmem))
        in_specs.append(pl.BlockSpec(b.shape, lambda i: (0, 0), memory_space=vmem))
        flat_inputs.extend([w, b])
    out_spec = pl.BlockSpec((tm, n_pad), lambda i: (i, 0), memory_space=vmem)

    # Advisory cost estimate so XLA can schedule surrounding ops.
    flops = 2 * M * sum(w.shape[0] * w.shape[1] for (w, _) in layers)
    transc = M * sum(w.shape[1] for (w, _) in layers[:-1])
    if fuse_tanh:
        transc += M * n_pad
    bytes_accessed = (x.size * x.dtype.itemsize
                      + sum(w.size * w.dtype.itemsize + b.size * b.dtype.itemsize
                            for (w, b) in layers)
                      + M * n_pad * jnp.dtype(out_dtype).itemsize)
    cost = pl.CostEstimate(flops=flops, transcendentals=transc,
                           bytes_accessed=bytes_accessed)

    out = pl.pallas_call(
        functools.partial(_mlp_fused_kernel, num_layers=n_layers,
                          output_tanh=fuse_tanh, matmul_dtype=matmul_dtype),
        out_shape=jax.ShapeDtypeStruct((M, n_pad), out_dtype),
        grid=grid,
        in_specs=in_specs,
        out_specs=out_spec,
        compiler_params=pltpu.CompilerParams(
            dimension_semantics=("parallel",),
            vmem_limit_bytes=int(min(64 * 2**20,
                                     max(32 * 2**20, 2 * vmem_est(tm)))),
        ),
        cost_estimate=cost,
    )(*flat_inputs)

    out = out[:, :n_out] if n_pad != n_out else out
    if output_activation is not None and not fuse_tanh:
        out = output_activation(out)
    # Mirrors torch .squeeze(): drops ALL unit dims (including batch if M == 1).
    return jnp.squeeze(out) if output_squeeze else out


def init_mlp_params(key, in_dim, hidden_sizes, dtype=jnp.float32):
    """Mirrors MLP.__init__: Linear(h_i, hidden_sizes[i]) with zero bias.

    Weights uniform(+-1/sqrt(fan_in)) like PyTorch's default; biases zero
    (nn.init.zeros_). Weights stored transposed as [in, out].
    """
    params = []
    dims = [in_dim] + list(hidden_sizes[:-1])
    for i, h in enumerate(dims):
        out = hidden_sizes[i]
        key, sub = jax.random.split(key)
        bound = 1.0 / float(jnp.sqrt(jnp.float32(h)))
        w_t = jax.random.uniform(sub, (h, out), dtype=dtype,
                                 minval=-bound, maxval=bound)
        b = jnp.zeros((1, out), dtype=dtype)
        params.append((w_t, b))
    return params


if __name__ == "__main__":
    key = jax.random.PRNGKey(0)
    in_dim = 16                 # observation dim -> x[0] in the torch module
    hidden_sizes = (32, 32, 4)  # two hidden layers + output layer

    pkey, xkey, xkey2 = jax.random.split(key, 3)
    params = init_mlp_params(pkey, in_dim, hidden_sizes)

    def ref_forward(xv, out_act=None):   # pure-JAX f32 reference
        h = xv
        for w_t, b in params[:-1]:
            h = jnp.tanh(h @ w_t + b)
        h = h @ params[-1][0] + params[-1][1]
        return out_act(h) if out_act is not None else h

    # Small batch, no output activation.
    x = jax.random.normal(xkey, (2, in_dim), dtype=jnp.float32)
    out = jax.block_until_ready(mlp_forward(params, x))
    assert out.shape == (2, hidden_sizes[-1]), out.shape
    # bf16 MXU path -> looser tolerance vs the f32 reference.
    assert jnp.allclose(out, ref_forward(x), atol=2e-2, rtol=2e-2)

    # Larger ragged batch (>=2 grid tiles for v7x) with a fused tanh output.
    x2 = jax.random.normal(xkey2, (100, in_dim), dtype=jnp.float32)
    out2 = jax.block_until_ready(
        mlp_forward(params, x2, output_activation=jnp.tanh))
    assert out2.shape == (100, hidden_sizes[-1]), out2.shape
    assert jnp.allclose(out2, ref_forward(x2, jnp.tanh), atol=2e-2, rtol=2e-2)

    print("KERNEL_OK")
</pallas_src>

<mosaic_0001>
module attributes {stable_mosaic.version = 11 : i64} {
  func.func @_mlp_fused_kernel(%arg0: i32, %arg1: memref<8x16xf32, #tpu.memory_space<vmem>>, %arg2: memref<16x128xbf16, #tpu.memory_space<vmem>>, %arg3: memref<1x128xf32, #tpu.memory_space<vmem>>, %arg4: memref<128x128xbf16, #tpu.memory_space<vmem>>, %arg5: memref<1x128xf32, #tpu.memory_space<vmem>>, %arg6: memref<128x128xbf16, #tpu.memory_space<vmem>>, %arg7: memref<1x128xf32, #tpu.memory_space<vmem>>, %arg8: memref<8x128xf32, #tpu.memory_space<vmem>>) attributes {dimension_semantics = [#tpu.dimension_semantics<parallel>], iteration_bounds = array<i64: 1>, scalar_prefetch = 0 : i64, scratch_operands = 0 : i64, tpu.core_type = #tpu.core_type<tc>, window_params = [{transform_indices = @transform_0, window_bounds = array<i64: 8, 16>}, {pipeline_mode = #tpu.pipeline_mode<synchronous>, transform_indices = @transform_1, window_bounds = array<i64: 16, 128>}, {pipeline_mode = #tpu.pipeline_mode<synchronous>, transform_indices = @transform_2, window_bounds = array<i64: 1, 128>}, {pipeline_mode = #tpu.pipeline_mode<synchronous>, transform_indices = @transform_3, window_bounds = array<i64: 128, 128>}, {pipeline_mode = #tpu.pipeline_mode<synchronous>, transform_indices = @transform_4, window_bounds = array<i64: 1, 128>}, {pipeline_mode = #tpu.pipeline_mode<synchronous>, transform_indices = @transform_5, window_bounds = array<i64: 128, 128>}, {pipeline_mode = #tpu.pipeline_mode<synchronous>, transform_indices = @transform_6, window_bounds = array<i64: 1, 128>}, {transform_indices = @transform_7, window_bounds = array<i64: 8, 128>}]} {
    %c0 = arith.constant 0 : index
    %c0_0 = arith.constant 0 : index
    %0 = vector.load %arg1[%c0, %c0_0] : memref<8x16xf32, #tpu.memory_space<vmem>>, vector<8x16xf32>
    %1 = arith.truncf %0 : vector<8x16xf32> to vector<8x16xbf16>
    %c0_1 = arith.constant 0 : index
    %c0_2 = arith.constant 0 : index
    %2 = vector.load %arg2[%c0_1, %c0_2] : memref<16x128xbf16, #tpu.memory_space<vmem>>, vector<16x128xbf16>
    %cst = arith.constant dense<0.000000e+00> : vector<8x128xf32>
    %3 = tpu.matmul %1, %2, %cst {dimension_numbers = #tpu.dot_dimension_numbers<[1], [0], [0], [1], [0, 0, 1, 1], [], []>} : vector<8x16xbf16>, vector<16x128xbf16>, vector<8x128xf32> -> vector<8x128xf32>
    %c0_3 = arith.constant 0 : index
    %c0_4 = arith.constant 0 : index
    %4 = vector.load %arg3[%c0_3, %c0_4] : memref<1x128xf32, #tpu.memory_space<vmem>>, vector<1x128xf32>
    %5 = vector.broadcast %4 : vector<1x128xf32> to vector<8x128xf32>
    %6 = arith.addf %3, %5 : vector<8x128xf32>
    %7 = math.tanh %6 : vector<8x128xf32>
    %8 = arith.truncf %7 : vector<8x128xf32> to vector<8x128xbf16>
    %c0_5 = arith.constant 0 : index
    %c0_6 = arith.constant 0 : index
    %9 = vector.load %arg4[%c0_5, %c0_6] : memref<128x128xbf16, #tpu.memory_space<vmem>>, vector<128x128xbf16>
    %cst_7 = arith.constant dense<0.000000e+00> : vector<8x128xf32>
    %10 = tpu.matmul %8, %9, %cst_7 {dimension_numbers = #tpu.dot_dimension_numbers<[1], [0], [0], [1], [0, 0, 1, 1], [], []>} : vector<8x128xbf16>, vector<128x128xbf16>, vector<8x128xf32> -> vector<8x128xf32>
    %c0_8 = arith.constant 0 : index
    %c0_9 = arith.constant 0 : index
    %11 = vector.load %arg5[%c0_8, %c0_9] : memref<1x128xf32, #tpu.memory_space<vmem>>, vector<1x128xf32>
    %12 = vector.broadcast %11 : vector<1x128xf32> to vector<8x128xf32>
    %13 = arith.addf %10, %12 : vector<8x128xf32>
    %14 = math.tanh %13 : vector<8x128xf32>
    %15 = arith.truncf %14 : vector<8x128xf32> to vector<8x128xbf16>
    %c0_10 = arith.constant 0 : index
    %c0_11 = arith.constant 0 : index
    %16 = vector.load %arg6[%c0_10, %c0_11] : memref<128x128xbf16, #tpu.memory_space<vmem>>, vector<128x128xbf16>
    %cst_12 = arith.constant dense<0.000000e+00> : vector<8x128xf32>
    %17 = tpu.matmul %15, %16, %cst_12 {dimension_numbers = #tpu.dot_dimension_numbers<[1], [0], [0], [1], [0, 0, 1, 1], [], []>} : vector<8x128xbf16>, vector<128x128xbf16>, vector<8x128xf32> -> vector<8x128xf32>
    %c0_13 = arith.constant 0 : index
    %c0_14 = arith.constant 0 : index
    %18 = vector.load %arg7[%c0_13, %c0_14] : memref<1x128xf32, #tpu.memory_space<vmem>>, vector<1x128xf32>
    %19 = vector.broadcast %18 : vector<1x128xf32> to vector<8x128xf32>
    %20 = arith.addf %17, %19 : vector<8x128xf32>
    %c0_15 = arith.constant 0 : index
    %c0_16 = arith.constant 0 : index
    %21 = vector.load %arg8[%c0_15, %c0_16] : memref<8x128xf32, #tpu.memory_space<vmem>>, vector<8x128xf32>
    tpu.vector_store %arg8[%c0_15, %c0_16], %20 {strides = array<i32>} : memref<8x128xf32, #tpu.memory_space<vmem>>, vector<8x128xf32>,
    return
  }
  func.func @transform_0(%arg0: i32) -> (i32, i32) {
    %c0_i32 = arith.constant 0 : i32
    %c0_i32_0 = arith.constant 0 : i32
    return %arg0, %c0_i32 : i32, i32
  }
  func.func @transform_1(%arg0: i32) -> (i32, i32) {
    %c0_i32 = arith.constant 0 : i32
    %c0_i32_0 = arith.constant 0 : i32
    %c0_i32_1 = arith.constant 0 : i32
    return %c0_i32, %c0_i32_0 : i32, i32
  }
  func.func @transform_2(%arg0: i32) -> (i32, i32) {
    %c0_i32 = arith.constant 0 : i32
    %c0_i32_0 = arith.constant 0 : i32
    %c0_i32_1 = arith.constant 0 : i32
    return %c0_i32, %c0_i32_0 : i32, i32
  }
  func.func @transform_3(%arg0: i32) -> (i32, i32) {
    %c0_i32 = arith.constant 0 : i32
    %c0_i32_0 = arith.constant 0 : i32
    %c0_i32_1 = arith.constant 0 : i32
    return %c0_i32, %c0_i32_0 : i32, i32
  }
  func.func @transform_4(%arg0: i32) -> (i32, i32) {
    %c0_i32 = arith.constant 0 : i32
    %c0_i32_0 = arith.constant 0 : i32
    %c0_i32_1 = arith.constant 0 : i32
    return %c0_i32, %c0_i32_0 : i32, i32
  }
  func.func @transform_5(%arg0: i32) -> (i32, i32) {
    %c0_i32 = arith.constant 0 : i32
    %c0_i32_0 = arith.constant 0 : i32
    %c0_i32_1 = arith.constant 0 : i32
    return %c0_i32, %c0_i32_0 : i32, i32
  }
  func.func @transform_6(%arg0: i32) -> (i32, i32) {
    %c0_i32 = arith.constant 0 : i32
    %c0_i32_0 = arith.constant 0 : i32
    %c0_i32_1 = arith.constant 0 : i32
    return %c0_i32, %c0_i32_0 : i32, i32
  }
  func.func @transform_7(%arg0: i32) -> (i32, i32) {
    %c0_i32 = arith.constant 0 : i32
    %c0_i32_0 = arith.constant 0 : i32
    return %arg0, %c0_i32 : i32, i32
  }
}

</mosaic_0001>

<bundles_post_ra>
// kernel: tpu_custom_call.1
= control target key start
LH: loop header
LB: loop body
LE: loop exit
PB: predicated region body
PF: predicated region fallthrough
CT: control target
= control target key end

     0   :  { %12 = vsyncpa [#allocation3], 0  ;;  %s730_s0 = inlined_call_operand.hbm [shape: f32[2,16], index: 0, kind: input, shape index: {}]   ;;  %s731_s1 = inlined_call_operand.hbm [shape: bf16[16,128], index: 1, kind: input, shape index: {}]   ;;  %s732_s2 = inlined_call_operand.vmem [shape: f32[1,128], index: 2, kind: input, shape index: {}]   ;;  %s733_s3 = inlined_call_operand.hbm [shape: bf16[128,128], index: 3, kind: input, shape index: {}]   ;;  %s734_s4 = inlined_call_operand.vmem [shape: f32[1,128], index: 4, kind: input, shape index: {}]   ;;  %s735_s5 = inlined_call_operand.hbm [shape: bf16[128,128], index: 5, kind: input, shape index: {}]   ;;  %s736_s6 = inlined_call_operand.vmem [shape: f32[1,128], index: 6, kind: input, shape index: {}]   ;;  %s737_s7 = inlined_call_operand.hbm [shape: f32[2,128], index: 7, kind: output, shape index: {}]  }
   0x1   :  { %13 = vsyncpa [#allocation6], 0 }
   0x2   :  { %14 = vsyncpa [#allocation9], 0 }
   0x3   :  { %15 = vsyncpa [#allocation4], 0 }
   0x4   :  { %20 = vsyncadd [#allocation3], 96  ;;  %s617_s24 = smov [#allocation5]  }
   0x5   :  { %s33_s25 = sshll.u32 %s617_s24, 4  ;;  %s34_s25 = int_to_ptr.vmem [resolvable:$true] %s33_s25 }
   0x6   :  { %s517_s26 = scalar_lea.vmem %s34_s25, 128  ;;  %p522_p1 = scmp.lt.s32.totalorder %s34_s25, %s34_s25 }
   0x7   :  { %p518_p0 = scmp.ne.s32.totalorder %s34_s25, %s517_s26  ;;  %p523_p2 = scmp.lt.s32.totalorder %s517_s26, %s517_s26 }
   0x9   :  { %p524_p3 = por %p523_p2, %p522_p1 }
   0xb   :  { %p525_p4 = pnand %p524_p3, %p518_p0 }
   0xd   :  { %528 = shalt.err (!%p525_p4)
}
   0xe   :  { %s618_s27 = smov 64   ;;  %s619_s28 = smov 4  }
   0xf   :  { %39 = dma.hbm_to_vmem [thread:$0]  %s731_s1, 128, %s34_s25, [#allocation6], %s618_s27, %s618_s27, %s619_s28  }
  0x10   :  { %s620_s8 = smov [#allocation2]  }
  0x11   :  { %s21_s9 = sshll.u32 %s620_s8, 4  ;;  %s22_s9 = int_to_ptr.vmem [resolvable:$true] %s21_s9 }
  0x12   :  { %s537_s10 = scalar_lea.vmem %s22_s9, 32  ;;  %s541_s11 = scalar_lea.vmem %s22_s9, 128 }
  0x13   :  { %p538_p5 = scmp.ne.s32.totalorder %s22_s9, %s537_s10  ;;  %p542_p6 = scmp.lt.s32.totalorder %s22_s9, %s22_s9 }
  0x14   :  { %p543_p7 = scmp.lt.s32.totalorder %s541_s11, %s537_s10 }
  0x16   :  { %p544_p8 = por %p543_p7, %p542_p6 }
  0x18   :  { %p545_p9 = pnand %p544_p8, %p538_p5 }
  0x1a   :  { %548 = shalt.err (!%p545_p9)
}
  0x1b   :  { %s621_s12 = smov 32   ;;  %s622_s13 = smov 2  }
  0x1c   :  { %27 = dma.hbm_to_vmem [thread:$0]  %s730_s0, 32, %s22_s9, [#allocation3], %s621_s12, %s621_s12, %s622_s13  }
  0x1d   :  { %s623_s1 = smov [#allocation7]   ;;  %s624_s17 = smov [#allocation8]  }
  0x1e   :  { %s47_s16 = sshll.u32 %s623_s1, 4  ;;  %s61_s18 = sshll.u32 %s624_s17, 4  ;;  %s48_s16 = int_to_ptr.vmem [resolvable:$true] %s47_s16  ;;  %s62_s18 = int_to_ptr.vmem [resolvable:$true] %s61_s18 }
  0x1f   :  { %s557_s19 = scalar_lea.vmem %s48_s16, 1024  ;;  %p562_p11 = scmp.lt.s32.totalorder %s48_s16, %s48_s16 }
  0x20   :  { %p558_p10 = scmp.ne.s32.totalorder %s48_s16, %s557_s19  ;;  %p563_p12 = scmp.lt.s32.totalorder %s557_s19, %s557_s19 }
  0x22   :  { %p564_p13 = por %p563_p12, %p562_p11 }
  0x24   :  { %p565_p0 = pnand %p564_p13, %p558_p10 }
  0x26   :  { %568 = shalt.err (!%p565_p0)
}
  0x27   :  { %53 = dma.hbm_to_vmem [thread:$0]  %s733_s3, 1024, %s48_s16, [#allocation6], %s618_s27, %s618_s27, %s619_s28  }
  0x28   :  { %s577_s0 = scalar_lea.vmem %s62_s18, 1024  ;;  %p582_p2 = scmp.lt.s32.totalorder %s62_s18, %s62_s18 }
  0x29   :  { %p578_p1 = scmp.ne.s32.totalorder %s62_s18, %s577_s0  ;;  %p583_p3 = scmp.lt.s32.totalorder %s577_s0, %s577_s0 }
  0x2b   :  { %p584_p4 = por %p583_p3, %p582_p2 }
  0x2d   :  { %p585_p5 = pnand %p584_p4, %p578_p1 }
  0x2f   :  { %588 = shalt.err (!%p585_p5)
}
  0x30   :  { %67 = dma.hbm_to_vmem [thread:$0]  %s735_s5, 1024, %s62_s18, [#allocation9], %s618_s27, %s618_s27, %s619_s28  }
  0x31   :  { %609 = dma.done.wait [#allocation3], 128  }
  0x32   :  { %610 = vsyncadd [#allocation3], 4294967168 }
  0x33   :  { %611 = dma.done.wait [#allocation6], 1152  }
  0x34   :  { %612 = vsyncadd [#allocation6], 4294966144 }
  0x35   :  { %613 = dma.done.wait [#allocation9], 1024  }
  0x36   :  { %614 = vsyncadd [#allocation9], 4294966272  ;;  %v625_v0 = vmov 0.0   ;;  %vm626_vm0 = vmmov 0   ;;  %v488_v1 = vld [vmem:[#allocation5] sm:$0xff]   ;;  %v83_v2 = vld [vmem:[#allocation2] sm:$0xff] }
  0x37   :  { %431 = vmatprep.subr.bf16.mxu0 %v625_v0  ;;  %433 = vmatprep.mubr.msk.bf16.mxu0 %vm626_vm0, %v625_v0  ;;  %v84_v3 = vpack.c.bf16 %v83_v2, %v83_v2  ;;  %vm100_vm1 = vcmask 130048   ;;  %v489_v4 = vld [vmem:[#allocation7 + $0x38] sm:$0xff]   ;;  %v490_v5 = vld [vmem:[#allocation7 + $0x30] sm:$0xff]   ;;  %v491_v6 = vld [vmem:[#allocation7 + $0x28] sm:$0xff]  }
  0x38   :  { %437 = vmatprep.subr.bf16.mxu1 %v625_v0  ;;  %453 = vmatprep.mubr.msk.bf16.mxu1 %vm626_vm0, %v625_v0  ;;  %v492_v7 = vld [vmem:[#allocation7 + $0x20] sm:$0xff]   ;;  %v493_v8 = vld [vmem:[#allocation7 + $0x18] sm:$0xff]   ;;  %v494_v9 = vld [vmem:[#allocation7 + $0x10] sm:$0xff]  }
  0x39   :  { %432 = vmatpush3.bf16.msra.mxu0 %v488_v1  ;;  %438 = vmatpush3.bf16.msra.mxu1 %v489_v4  ;;  %v495_v10 = vld [vmem:[#allocation7 + $0x8] sm:$0xff]   ;;  %v496_v11 = vld [vmem:[#allocation7] sm:$0xff]   ;;  %v497_v12 = vld [vmem:[#allocation8 + $0x38] sm:$0xff]  }
  0x3a   :  { %457 = vmatprep.subr.bf16.mxu0 %v625_v0  ;;  %439 = vmatprep.subr.bf16.mxu1 %v625_v0  ;;  %v498_v13 = vld [vmem:[#allocation8 + $0x30] sm:$0xff]   ;;  %v499_v14 = vld [vmem:[#allocation8 + $0x28] sm:$0xff]   ;;  %v500_v23 = vld [vmem:[#allocation8 + $0x20] sm:$0xff]  }
  0x3b   :  { %v390_v15 = vld [vmem:[%s732_s2] ss:$0 sm:$0xff]  ;;  %v501_v24 = vld [vmem:[#allocation8 + $0x18] sm:$0xff]   ;;  %v503_v26 = vld [vmem:[#allocation8 + $0x8] sm:$0xff]  }
  0x3c   :  { %434 = vmatmul.mubr.msk.bf16.vlgmr.msra.gmra.mxu0 %vm100_vm1, %v84_v3  ;;  %v502_v25 = vld [vmem:[#allocation8 + $0x10] sm:$0xff]   ;;  %v504_v27 = vld [vmem:[#allocation8] sm:$0xff]  }
  0x3d   :  { %473 = vmatprep.mubr.msk.bf16.mxu0 %vm626_vm0, %v625_v0  ;;  %440 = vmatpush3.bf16.msra.mxu1 %v490_v5  ;;  %v393_v28 = vld [vmem:[%s734_s4] ss:$0 sm:$0xff] }
  0x3e   :  { %441 = vmatprep.subr.bf16.mxu1 %v625_v0  ;;  %458 = vmatpush3.bf16.msra.mxu0 %v497_v12  ;;  %v402_v36 = vld [vmem:[%s736_s6] ss:$0 sm:$0xff] }
  0x3f   :  { %459 = vmatprep.subr.bf16.mxu0 %v625_v0 }
  0x41   :  { %442 = vmatpush3.bf16.msra.mxu1 %v491_v6 }
  0x42   :  { %443 = vmatprep.subr.bf16.mxu1 %v625_v0  ;;  %460 = vmatpush3.bf16.msra.mxu0 %v498_v13 }
  0x43   :  { %461 = vmatprep.subr.bf16.mxu0 %v625_v0 }
  0x45   :  { %444 = vmatpush3.bf16.msra.mxu1 %v492_v7 }
  0x46   :  { %445 = vmatprep.subr.bf16.mxu1 %v625_v0  ;;  %462 = vmatpush3.bf16.msra.mxu0 %v499_v14 }
  0x47   :  { %463 = vmatprep.subr.bf16.mxu0 %v625_v0 }
  0x49   :  { %446 = vmatpush3.bf16.msra.mxu1 %v493_v8 }
  0x4a   :  { %447 = vmatprep.subr.bf16.mxu1 %v625_v0  ;;  %464 = vmatpush3.bf16.msra.mxu0 %v500_v23 }
  0x4b   :  { %465 = vmatprep.subr.bf16.mxu0 %v625_v0 }
  0x4d   :  { %448 = vmatpush3.bf16.msra.mxu1 %v494_v9 }
  0x4e   :  { %449 = vmatprep.subr.bf16.mxu1 %v625_v0  ;;  %466 = vmatpush3.bf16.msra.mxu0 %v501_v24 }
  0x4f   :  { %467 = vmatprep.subr.bf16.mxu0 %v625_v0 }
  0x51   :  { %450 = vmatpush3.bf16.msra.mxu1 %v495_v10 }
  0x52   :  { %451 = vmatprep.subr.bf16.mxu1 %v625_v0  ;;  %468 = vmatpush3.bf16.msra.mxu0 %v502_v25 }
  0x53   :  { %469 = vmatprep.subr.bf16.mxu0 %v625_v0 }
  0x55   :  { %452 = vmatpush3.bf16.msra.mxu1 %v496_v11 }
  0x56   :  { %470 = vmatpush3.bf16.msra.mxu0 %v503_v26 }
  0x57   :  { %471 = vmatprep.subr.bf16.mxu0 %v625_v0 }
  0x5a   :  { %472 = vmatpush3.bf16.msra.mxu0 %v504_v27 }
  0xfc   :  { %v138_v16 = vpop.f32.mrf.mxu0 }
  0xfd   :  { %v139_v17 = vadd.f32 %v390_v15, %v138_v16 }
  0xfe   :  { %v435_v18 = vpop.f32.mrf.mxu0 }
  0xff   :  { %505 = vtanh.f32 %v139_v17 }
 0x100   :  { %v141_v19 = vpop.f32.mrf.mxu0 }
 0x102   :  { %v436_v20 = vpop.f32.mrf.mxu0 }
 0x10c   :  { %v506_v21 = vpop.eup %505 }
 0x10d   :  { %v145_v22 = vpack.c.bf16 %v506_v21, %v506_v21 }
 0x10f   :  { %454 = vmatmul.mubr.bf16.vlgmr.msra.gmra.mxu1 %v145_v22 }
 0x1cf   :  { %v251_v29 = vpop.f32.mrf.mxu1 }
 0x1d0   :  { %v252_v30 = vadd.f32 %v393_v28, %v251_v29 }
 0x1d1   :  { %v455_v31 = vpop.f32.mrf.mxu1 }
 0x1d2   :  { %507 = vtanh.f32 %v252_v30 }
 0x1d3   :  { %v254_v32 = vpop.f32.mrf.mxu1 }
 0x1d5   :  { %v456_v33 = vpop.f32.mrf.mxu1 }
 0x1df   :  { %v508_v34 = vpop.eup %507 }
 0x1e0   :  { %v258_v35 = vpack.c.bf16 %v508_v34, %v508_v34 }
 0x1e2   :  { %474 = vmatmul.mubr.bf16.vlgmr.msra.gmra.mxu0 %v258_v35 }
 0x2a2   :  { %v364_v37 = vpop.f32.mrf.mxu0 }
 0x2a3   :  { %v365_v38 = vadd.f32 %v402_v36, %v364_v37 }
 0x2a4   :  { %v475_v39 = vpop.f32.mrf.mxu0 }
 0x2a5   :  { %370 = vst [vmem:[#allocation10] sm:$0xff] %v365_v38 }
 0x2a6   :  { %v367_v40 = vpop.f32.mrf.mxu0 }
 0x2a8   :  { %v476_v41 = vpop.f32.mrf.mxu0 }
 0x2a9   :  { %375 = vsyncadd [#allocation4], 96  ;;  %s627_s4 = smov [#allocation10]  }
 0x2aa   :  { %s376_s27 = sshll.u32 %s627_s4, 4  ;;  %s377_s27 = int_to_ptr.vmem [resolvable:$true] %s376_s27 }
 0x2ab   :  { %s589_s28 = scalar_lea.vmem %s377_s27, 32  ;;  %s593_s29 = scalar_lea.vmem %s377_s27, 128 }
 0x2ac   :  { %p590_p6 = scmp.ne.s32.totalorder %s377_s27, %s589_s28  ;;  %p594_p7 = scmp.lt.s32.totalorder %s377_s27, %s377_s27 }
 0x2ad   :  { %p595_p8 = scmp.lt.s32.totalorder %s593_s29, %s589_s28 }
 0x2af   :  { %p596_p9 = por %p595_p8, %p594_p7 }
 0x2b1   :  { %p597_p10 = pnand %p596_p9, %p590_p6 }
 0x2b3   :  { %600 = shalt.err (!%p597_p10)
}
 0x2b4   :  { %382 = dma.vmem_to_hbm [thread:$0]  %s377_s27, 32, %s737_s7, [#allocation4], %s621_s12, %s621_s12, %s622_s13  }
 0x2b5   :  { %615 = dma.done.wait [#allocation4], 128  }
 0x2b6   :  { %616 = vsyncadd [#allocation4], 4294967168 }
 0x2b7   :  { %386 = vsyncpa [#allocation3], 1 }
 0x2b8   :  { %387 = vsyncpa [#allocation6], 1 }
 0x2b9   :  { %388 = vsyncpa [#allocation9], 1 }
 0x2ba   :  { %389 = vsyncpa [#allocation4], 1 }

</bundles_post_ra>
